<compile_context>
chip_gen: v5e
topology: v5e:2x2
jax: 0.10.0
libtpu: 0.0.40
codegen_flags: <defaults>
</compile_context>

<pallas_src>
import functools

import numpy as np
import jax
import jax.numpy as jnp
from jax.experimental import pallas as pl
from jax.experimental.pallas import tpu as pltpu

_PI = 3.14159265358979
_HALF_PI = 1.57079632679490
_QUARTER_PI = 0.78539816339745


def _round_up(x, m):
    return (x + m - 1) // m * m


def _hann_periodic(win_len):
    # == scipy.signal.get_window('hann', win_len, fftbins=True), avoids scipy dep
    n = np.arange(win_len)
    return 0.5 - 0.5 * np.cos(2.0 * np.pi * n / win_len)


def init_stft_weights(win_len, fft_len, win_type="hann"):
    """Deterministic re-implementation of init_kernel() (split real/imag)."""
    if win_type is None:
        window = np.ones(win_len, dtype=np.float64)
    else:
        window = _hann_periodic(win_len)
    fourier_basis = np.fft.rfft(np.eye(fft_len))[:win_len]      # (win_len, fft_len//2+1)
    wr = (np.real(fourier_basis) * window[:, None]).astype(np.float32)
    wi = (np.imag(fourier_basis) * window[:, None]).astype(np.float32)
    return jnp.asarray(wr), jnp.asarray(wi)


def prepare_stft_weights(wr, wi, *, lane=128):
    """Fuse and pre-transpose the basis into one bf16 matrix of shape (2*Fp, Kp)."""
    K, F = wr.shape
    Fp = _round_up(F, lane)       # real/imag halves start at 128-aligned sublane offsets
    Kp = _round_up(K, lane)       # contraction dim 128-aligned (MXU / lane tiles)
    w = jnp.zeros((2 * Fp, Kp), jnp.float32)
    w = w.at[:F, :K].set(wr.T).at[Fp:Fp + F, :K].set(wi.T)
    return w.astype(jnp.bfloat16), Fp, Kp


def _fast_atan2(imag, real):
    """Quadrant-corrected atan2, max error ~1.5e-3 rad, ~10 cheap VPU ops/elem."""
    ax = jnp.abs(real)
    ay = jnp.abs(imag)
    mx = jnp.maximum(ax, ay)
    mn = jnp.minimum(ax, ay)
    t = mn * pl.reciprocal(mx + 1e-30, approx=True)             # t in [0, 1]
    # atan(t) on [0,1]: (pi/4)t + t(1-t)(0.2447 + 0.0663 t)  (Rajan et al. 2006)
    p = t * (_QUARTER_PI + (1.0 - t) * (0.2447 + 0.0663 * t))
    p = jnp.where(ay > ax, _HALF_PI - p, p)
    p = jnp.where(real < 0.0, _PI - p, p)
    return jnp.where(imag < 0.0, -p, p)


def _stft_kernel(frames_ref, w_ref, mags_ref, phase_ref, *, f_pad):
    # frames_ref : (1, Kp, TILE_F) bf16   (frames pre-transposed by the wrapper)
    # w_ref      : (2*Fp, Kp)      bf16   (constant index_map -> VMEM resident)
    # mags_ref / phase_ref : (1, Fp, TILE_F) f32  (already in (F, frames) layout)
    res = jnp.dot(w_ref[...], frames_ref[0],
                  preferred_element_type=jnp.float32)            # (2*Fp, TILE_F)
    real = res[:f_pad, :]                                        # 128-aligned sublane slices
    imag = res[f_pad:, :]
    sumsq = real * real + imag * imag
    mags = sumsq * jax.lax.rsqrt(sumsq + 1e-30)                  # EUP rsqrt; 0 -> 0, no NaN
    mags_ref[0] = mags
    phase_ref[0] = _fast_atan2(imag, real)


def _frame_signal(x, win_len, win_inc, n_frames):
    """(B, T) -> (B, n_frames, win_len) without an XLA gather when win_inc | win_len."""
    B, _ = x.shape
    if win_len % win_inc == 0:
        hop = win_inc
        cols = [
            jax.lax.slice_in_dim(x, j * hop, j * hop + n_frames * hop, axis=1)
               .reshape(B, n_frames, hop)
            for j in range(win_len // hop)
        ]
        return jnp.concatenate(cols, axis=2)
    # Fallback for non-divisible hop: strided gather.
    idx = jnp.arange(n_frames)[:, None] * win_inc + jnp.arange(win_len)[None, :]
    return x[:, idx]


def conv_stft(x, wr, wi, win_len, win_inc, *, tile_frames=512):
    """x: (B, T) or (B, 1, T) -> (mags, phase), each (B, fft_len//2+1, n_frames) f32."""
    if x.ndim == 3:                       # torch module's unsqueeze(1) case
        x = x[:, 0, :]
    B, T = x.shape
    if T < win_len:
        raise ValueError(f"signal length {T} shorter than win_len {win_len}")
    n_frames = (T - win_len) // win_inc + 1
    F_bins = wr.shape[1]

    # Fused, pre-transposed, padded bf16 basis (stays resident in VMEM).
    w, Fp, Kp = prepare_stft_weights(wr, wi)

    # Frame-axis tiling (128-multiples for lane-dense stores).  Modest default
    # so double-buffered in/out + intermediates fit v5e's scoped-VMEM default.
    tile_frames = max(128, _round_up(int(tile_frames), 128))
    TILE_F = min(tile_frames, _round_up(n_frames, 128))
    # v7x dual-TC: if batch alone gives no parallelism, split the frame axis
    # so the all-"parallel" grid has at least 2 steps.
    if B == 1 and _round_up(n_frames, 128) // TILE_F < 2 and n_frames > 128:
        TILE_F = max(128, _round_up(_round_up(n_frames, 128) // 2, 128))
    NF_pad = _round_up(n_frames, TILE_F)

    # Frame in bf16 (halves the intermediate's HBM bytes) and pre-transpose so
    # the kernel result is already (F, frames) — no in-kernel transposes.
    frames = _frame_signal(x.astype(jnp.bfloat16), win_len, win_inc, n_frames)
    frames = jnp.swapaxes(frames, 1, 2)                          # (B, win_len, n_frames)
    frames = jnp.pad(frames, ((0, 0), (0, Kp - win_len), (0, NF_pad - n_frames)))

    grid = (B, NF_pad // TILE_F)
    kernel = functools.partial(_stft_kernel, f_pad=Fp)

    mags_p, phase_p = pl.pallas_call(
        kernel,
        out_shape=(
            jax.ShapeDtypeStruct((B, Fp, NF_pad), jnp.float32),
            jax.ShapeDtypeStruct((B, Fp, NF_pad), jnp.float32),
        ),
        grid=grid,
        in_specs=[
            pl.BlockSpec((1, Kp, TILE_F), lambda b, i: (b, 0, i)),   # frame tiles (pipelined)
            pl.BlockSpec((2 * Fp, Kp), lambda b, i: (0, 0)),         # basis: resident, no re-DMA
        ],
        out_specs=(
            pl.BlockSpec((1, Fp, TILE_F), lambda b, i: (b, 0, i)),
            pl.BlockSpec((1, Fp, TILE_F), lambda b, i: (b, 0, i)),
        ),
        compiler_params=pltpu.CompilerParams(
            dimension_semantics=("parallel", "parallel"),
        ),
    )(frames, w)

    # Outputs already in (B, F, n_frames) layout; only strip padding.
    return mags_p[:, :F_bins, :n_frames], phase_p[:, :F_bins, :n_frames]


if __name__ == "__main__":
    # Small, module-consistent config: ConvSTFT(win_len=16, win_inc=8, fft_len=16,
    # win_type='hann', feature_type='real')
    win_len, win_inc, fft_len = 16, 8, 16
    B, T = 2, 80
    dim = fft_len // 2 + 1

    wr, wi = init_stft_weights(win_len, fft_len, "hann")

    key = jax.random.PRNGKey(0)
    x = jax.random.normal(key, (B, T), dtype=jnp.float32)

    mags, phase = conv_stft(x, wr, wi, win_len, win_inc)
    mags, phase = jax.block_until_ready((mags, phase))

    # Reference: exact F.conv1d semantics via lax.conv_general_dilated (f32).
    w_ref = jnp.concatenate([wr, wi], axis=1).T[:, None, :]      # (2*dim, 1, win_len)
    out = jax.lax.conv_general_dilated(
        x[:, None, :], w_ref, window_strides=(win_inc,), padding="VALID",
        dimension_numbers=("NCH", "OIH", "NCH"))
    real_ref, imag_ref = out[:, :dim, :], out[:, dim:, :]
    mags_ref = jnp.sqrt(real_ref ** 2 + imag_ref ** 2)

    # Robust check: reconstruct real/imag from (mags, phase) to avoid phase-wrap
    # issues near zero magnitude.
    real_k = mags * jnp.cos(phase)
    imag_k = mags * jnp.sin(phase)

    n_frames = (T - win_len) // win_inc + 1
    assert mags.shape == (B, dim, n_frames) and phase.shape == (B, dim, n_frames)
    assert jnp.allclose(mags, mags_ref, atol=5e-2, rtol=5e-2)
    assert jnp.allclose(real_k, real_ref, atol=5e-2, rtol=5e-2)
    assert jnp.allclose(imag_k, imag_ref, atol=5e-2, rtol=5e-2)
    print("KERNEL_OK")
</pallas_src>

<mosaic_0001>
module attributes {stable_mosaic.version = 11 : i64} {
  func.func @_stft_kernel(%arg0: i32, %arg1: i32, %arg2: memref<1x128x128xbf16, #tpu.memory_space<vmem>>, %arg3: memref<256x128xbf16, #tpu.memory_space<vmem>>, %arg4: memref<1x128x128xf32, #tpu.memory_space<vmem>>, %arg5: memref<1x128x128xf32, #tpu.memory_space<vmem>>) attributes {dimension_semantics = [#tpu.dimension_semantics<parallel>, #tpu.dimension_semantics<parallel>], iteration_bounds = array<i64: 2, 1>, scalar_prefetch = 0 : i64, scratch_operands = 0 : i64, tpu.core_type = #tpu.core_type<tc>, window_params = [{transform_indices = @transform_0, window_bounds = array<i64: 1, 128, 128>}, {pipeline_mode = #tpu.pipeline_mode<synchronous>, transform_indices = @transform_1, window_bounds = array<i64: 256, 128>}, {transform_indices = @transform_2, window_bounds = array<i64: 1, 128, 128>}, {transform_indices = @transform_3, window_bounds = array<i64: 1, 128, 128>}]} {
    %c0 = arith.constant 0 : index
    %c0_0 = arith.constant 0 : index
    %0 = vector.load %arg3[%c0, %c0_0] : memref<256x128xbf16, #tpu.memory_space<vmem>>, vector<256x128xbf16>
    %c0_1 = arith.constant 0 : index
    %c0_2 = arith.constant 0 : index
    %c0_3 = arith.constant 0 : index
    %1 = vector.load %arg2[%c0_1, %c0_2, %c0_3] : memref<1x128x128xbf16, #tpu.memory_space<vmem>>, vector<1x128x128xbf16>
    %2 = vector.shape_cast %1 : vector<1x128x128xbf16> to vector<128x128xbf16>
    %cst = arith.constant dense<0.000000e+00> : vector<256x128xf32>
    %3 = tpu.matmul %0, %2, %cst {dimension_numbers = #tpu.dot_dimension_numbers<[1], [0], [0], [1], [0, 0, 1, 1], [], []>} : vector<256x128xbf16>, vector<128x128xbf16>, vector<256x128xf32> -> vector<256x128xf32>
    %4 = vector.extract_strided_slice %3 {offsets = [0, 0], sizes = [128, 128], strides = [1, 1]} : vector<256x128xf32> to vector<128x128xf32>
    %5 = vector.extract_strided_slice %3 {offsets = [128, 0], sizes = [128, 128], strides = [1, 1]} : vector<256x128xf32> to vector<128x128xf32>
    %6 = arith.mulf %4, %4 : vector<128x128xf32>
    %7 = arith.mulf %5, %5 : vector<128x128xf32>
    %8 = arith.addf %6, %7 : vector<128x128xf32>
    %cst_4 = arith.constant 1.000000e-30 : f32
    %9 = vector.broadcast %cst_4 : f32 to vector<128x128xf32>
    %10 = arith.addf %8, %9 : vector<128x128xf32>
    %11 = math.rsqrt %10 : vector<128x128xf32>
    %12 = arith.mulf %8, %11 : vector<128x128xf32>
    %c0_5 = arith.constant 0 : index
    %c0_6 = arith.constant 0 : index
    %c0_7 = arith.constant 0 : index
    %13 = vector.load %arg4[%c0_5, %c0_6, %c0_7] : memref<1x128x128xf32, #tpu.memory_space<vmem>>, vector<1x128x128xf32>
    %14 = vector.shape_cast %13 : vector<1x128x128xf32> to vector<128x128xf32>
    %15 = vector.shape_cast %12 : vector<128x128xf32> to vector<1x128x128xf32>
    tpu.vector_store %arg4[%c0_5, %c0_6, %c0_7], %15 {strides = array<i32>} : memref<1x128x128xf32, #tpu.memory_space<vmem>>, vector<1x128x128xf32>,
    %16 = math.absf %4 : vector<128x128xf32>
    %17 = math.absf %5 : vector<128x128xf32>
    %18 = arith.maximumf %16, %17 : vector<128x128xf32>
    %19 = arith.minimumf %16, %17 : vector<128x128xf32>
    %cst_8 = arith.constant 1.000000e-30 : f32
    %20 = vector.broadcast %cst_8 : f32 to vector<128x128xf32>
    %21 = arith.addf %18, %20 : vector<128x128xf32>
    %22 = tpu.reciprocal %21 {approx = true} : vector<128x128xf32> -> vector<128x128xf32>
    %23 = arith.mulf %19, %22 : vector<128x128xf32>
    %cst_9 = arith.constant 1.000000e+00 : f32
    %24 = vector.broadcast %cst_9 : f32 to vector<128x128xf32>
    %25 = arith.subf %24, %23 : vector<128x128xf32>
    %cst_10 = arith.constant 6.630000e-02 : f32
    %26 = vector.broadcast %cst_10 : f32 to vector<128x128xf32>
    %27 = arith.mulf %26, %23 : vector<128x128xf32>
    %cst_11 = arith.constant 2.447000e-01 : f32
    %28 = vector.broadcast %cst_11 : f32 to vector<128x128xf32>
    %29 = arith.addf %28, %27 : vector<128x128xf32>
    %30 = arith.mulf %25, %29 : vector<128x128xf32>
    %cst_12 = arith.constant 0.785398185 : f32
    %31 = vector.broadcast %cst_12 : f32 to vector<128x128xf32>
    %32 = arith.addf %31, %30 : vector<128x128xf32>
    %33 = arith.mulf %23, %32 : vector<128x128xf32>
    %34 = arith.cmpf ogt, %17, %16 : vector<128x128xf32>
    %cst_13 = arith.constant 1.57079637 : f32
    %35 = vector.broadcast %cst_13 : f32 to vector<128x128xf32>
    %36 = arith.subf %35, %33 : vector<128x128xf32>
    %37 = arith.select %34, %36, %33 : vector<128x128xi1>, vector<128x128xf32>
    %cst_14 = arith.constant 0.000000e+00 : f32
    %38 = vector.broadcast %cst_14 : f32 to vector<128x128xf32>
    %39 = arith.cmpf olt, %4, %38 : vector<128x128xf32>
    %cst_15 = arith.constant 3.14159274 : f32
    %40 = vector.broadcast %cst_15 : f32 to vector<128x128xf32>
    %41 = arith.subf %40, %37 : vector<128x128xf32>
    %42 = arith.select %39, %41, %37 : vector<128x128xi1>, vector<128x128xf32>
    %cst_16 = arith.constant 0.000000e+00 : f32
    %43 = vector.broadcast %cst_16 : f32 to vector<128x128xf32>
    %44 = arith.cmpf olt, %5, %43 : vector<128x128xf32>
    %cst_17 = arith.constant 0.000000e+00 : f32
    %45 = vector.broadcast %cst_17 : f32 to vector<128x128xf32>
    %46 = arith.subf %45, %42 : vector<128x128xf32>
    %47 = arith.select %44, %46, %42 : vector<128x128xi1>, vector<128x128xf32>
    %c0_18 = arith.constant 0 : index
    %c0_19 = arith.constant 0 : index
    %c0_20 = arith.constant 0 : index
    %48 = vector.load %arg5[%c0_18, %c0_19, %c0_20] : memref<1x128x128xf32, #tpu.memory_space<vmem>>, vector<1x128x128xf32>
    %49 = vector.shape_cast %48 : vector<1x128x128xf32> to vector<128x128xf32>
    %50 = vector.shape_cast %47 : vector<128x128xf32> to vector<1x128x128xf32>
    tpu.vector_store %arg5[%c0_18, %c0_19, %c0_20], %50 {strides = array<i32>} : memref<1x128x128xf32, #tpu.memory_space<vmem>>, vector<1x128x128xf32>,
    return
  }
  func.func @transform_0(%arg0: i32, %arg1: i32) -> (i32, i32, i32) {
    %c0_i32 = arith.constant 0 : i32
    %c0_i32_0 = arith.constant 0 : i32
    return %arg0, %c0_i32, %arg1 : i32, i32, i32
  }
  func.func @transform_1(%arg0: i32, %arg1: i32) -> (i32, i32) {
    %c0_i32 = arith.constant 0 : i32
    %c0_i32_0 = arith.constant 0 : i32
    %c0_i32_1 = arith.constant 0 : i32
    return %c0_i32, %c0_i32_0 : i32, i32
  }
  func.func @transform_2(%arg0: i32, %arg1: i32) -> (i32, i32, i32) {
    %c0_i32 = arith.constant 0 : i32
    %c0_i32_0 = arith.constant 0 : i32
    return %arg0, %c0_i32, %arg1 : i32, i32, i32
  }
  func.func @transform_3(%arg0: i32, %arg1: i32) -> (i32, i32, i32) {
    %c0_i32 = arith.constant 0 : i32
    %c0_i32_0 = arith.constant 0 : i32
    return %arg0, %c0_i32, %arg1 : i32, i32, i32
  }
}

</mosaic_0001>

<bundles_post_ra>
// kernel: tpu_custom_call.1
= control target key start
LH: loop header
LB: loop body
LE: loop exit
PB: predicated region body
PF: predicated region fallthrough
CT: control target
= control target key end

     0   :  { %s2713_s0 = inlined_call_operand.hbm [shape: bf16[2,128,128], index: 0, kind: input, shape index: {}]   ;;  %s2714_s1 = inlined_call_operand.hbm [shape: bf16[256,128], index: 1, kind: input, shape index: {}]   ;;  %s2715_s2 = inlined_call_operand.hbm [shape: f32[2,128,128], index: 2, kind: output, shape index: {0}]   ;;  %s2716_s3 = inlined_call_operand.hbm [shape: f32[2,128,128], index: 3, kind: output, shape index: {1}]  }
   0x1   :  { %2718 = sst [smem:[#allocation14_spill]] %s2714_s1 }
   0x2   :  { %9 = vsyncpa [#allocation3], 0 }
   0x3   :  { %11 = vsyncpa [#allocation3 + $0x1], 0 }
   0x4   :  { %12 = vsyncpa [#allocation6], 0 }
   0x5   :  { %13 = vsyncpa [#allocation4], 0 }
   0x6   :  { %15 = vsyncpa [#allocation4 + $0x1], 0 }
   0x7   :  { %16 = vsyncpa [#allocation9], 0 }
   0x8   :  { %18 = vsyncpa [#allocation9 + $0x1], 0  ;;  %s1832_s12 = smov 0   ;;  %s1834_s13 = smov 0  }
   0x9   :  { %s1836_s14 = smov 0   ;;  %s1838_s15 = smov 0  }
   0xa   :  { %s1840_s16 = smov 0   ;;  %s1842_s17 = smov 0  }
   0xb LB: > { %s1313_s18 = sadd.s32 4294967295, %s1805_s17   ;;  %s1314_s19 = sadd.s32 4294967294, %s1805_s17   ;;  %s1805_s17 = sphi %s1842_s17, %s24_s17   ;;  %s1801_s16 = sphi %s1840_s16, %s2732_s16   ;;  %s1797_s15 = sphi %s1838_s15, %s2731_s15   ;;  %s1793_s14 = sphi %s1836_s14, %s2730_s14   ;;  %s1789_s13 = sphi %s1834_s13, %s2729_s13   ;;  %s1785_s12 = sphi %s1832_s12, %s2728_s12  }
   0xc   : > { %p58_p0 = scmp.ne.s32.totalorder %s1789_s13, %s1785_s12  ;;  %p1866_p1 = scmp.eq.s32.totalorder %s1313_s18, 0 }
   0xd   : > { %p1870_p2 = scmp.eq.s32.totalorder %s1313_s18, 1  ;;  %p111_p3 = scmp.eq.s32.totalorder %s1314_s19, 1 }
   0xe   : > { %p1876_p4 = por %p1866_p1, %p58_p0  ;;  %p1315_p5 = scmp.ge.s32.totalorder %s1805_s17, 1 }
   0xf   : > { %p1881_p6 = por %p111_p3, %p58_p0  ;;  %p146_p7 = scmp.lt.s32.totalorder %s1805_s17, 3 }
  0x10   : > { %s2723_s1 = sld [smem:[#allocation14_spill]]  ;;  %s1807_s28 = smov [#allocation5]  }
  0x11   : > { %p1889_p8 = pnand %p1315_p5, %p146_p7  ;;  %s159_s29 = sshll.u32 %s1807_s28, 4  ;;  %s160_s29 = int_to_ptr.vmem [resolvable:$true] %s159_s29 }
  0x12   : > { %p1317_p11 = scmp.ge.s32.totalorder %s1805_s17, 2  ;;  %s2717_s30 = smov 64  }
  0x13   : > { %p1491_p9 = pneg %p1889_p8  ;;  %s1809_s4 = smov 4  }
  0x14   : > { %s36_s5 = sadd.s32 1, %s1801_s16  ;;  %s45_s6 = sadd.s32 1, %s1793_s14 }
  0x15   : > { %p1492_p10 = pnand %p1491_p9, %p1866_p1  ;;  %p38_p12 = scmp.ge.s32.totalorder %s36_s5, 2 }
  0x16   : > { %s157_s26 = sshll.u32 %s2723_s1, 4  ;;  %p52_p13 = scmp.ne.s32.totalorder %s1793_s14, %s1789_s13  ;;  %s158_s26 = int_to_ptr.hbm [resolvable:$true] %s157_s26 }
  0x17   : > { %1494 = dma.hbm_to_vmem [thread:$0]  (!%p1492_p10), %s158_s26, 2048, %s160_s29, [#allocation6], %s2717_s30, %s2717_s30, %s1809_s4  }
  0x18   : > { %p53_p0 = scmp.eq.s32.totalorder %s1805_s17, 0  ;;  %s2734_s5 = smov (%p38_p12, %s36_s5), 0 }
  0x19   : > { %p1914_p5 = por %p1870_p2, %p52_p13  ;;  %s40_s9 = ssub.s32 %s1801_s16, %s2734_s5 }
  0x1a   : > { %p1908_p3 = por %p53_p0, %p52_p13  ;;  %p1507_p7 = scmp.lt.s32.totalorder %s1805_s17, 2 }
  0x1b   : > { %p43_p9 = scmp.eq.s32.totalorder %s40_s9, 0  ;;  %s173_s10 = sand.u32 1, %s1793_s14  }
  0x1c   : > { %s1318_s11 = sshll.u32 %s173_s10, 6  ;;  %s1430_s19 = sshll.u32 %s1801_s16, 6 }
  0x1d   : > { %s1923_s18 = scalar_select %p43_p9, %s1793_s14, %s45_s6  }
  0x1e   : > { %s183_s26 = scalar_lea.hbm %s2713_s0, %s1430_s19  ;;  %s177_s28 = scalar_lea.vmem [#allocation2], %s1318_s11 }
  0x1f   : > { %s186_s29 = sshll.u32 %s177_s28, 4  ;;  %s184_s21 = sshll.u32 %s183_s26, 4  ;;  %s187_s29 = int_to_ptr.vmem [resolvable:$true] %s186_s29  ;;  %s185_s21 = int_to_ptr.hbm [resolvable:$true] %s184_s21 }
  0x20   : > { %p1496_p2 = pnand %p1507_p7, %p1908_p3  ;;  %s174_s30 = scalar_lea.sflag [#allocation3], %s173_s10 }
  0x21   : > { %s2727_s1 = smov 64   ;;  %198 = sbr.rel (%p1889_p8) target bundleno = 371 (0x173), region = 28 }
  0x22   : > { %1498 = dma.hbm_to_vmem [thread:$0]  (!%p1496_p2), %s185_s21, 1024, %s187_s29, %s174_s30, %s2727_s1, %s2727_s1, %s1809_s4  }
  0x23   : > { %s1937_s6 = sand.u32 (!%p1889_p8), 1, %s1789_s13  }
  0x24   : > { %s1322_s9 = sshll.u32 (!%p1889_p8), %s1937_s6, 6  ;;  %s201_s11 = scalar_lea.sflag (!%p1889_p8), [#allocation3], %s1937_s6 }
  0x25   : > { %s1941_s19 = scalar_lea.vmem (!%p1889_p8), [#allocation2], %s1322_s9 }
  0x26   : > { %1768 = dma.done.wait (%p1876_p4), %s201_s11, 1024  }
  0x27   : > { %1770 = vsyncadd (%p1876_p4), %s201_s11, 4294966272 }
  0x28   : > { %1772 = dma.done.wait (%p1866_p1), [#allocation6], 2048  }
  0x29   : > { %1774 = vsyncadd (%p1866_p1), [#allocation6], 4294965248  ;;  %v1454_v0 = vld [vmem:[%s1941_s19 + $0x38] sm:$0xff]  ;;  %v1453_v1 = vld [vmem:[%s1941_s19 + $0x30] sm:$0xff]  ;;  %s1324_s1 = sshll.u32 %s1937_s6, 7  ;;  %s1455_s27 = sshll.u32 %s1797_s15, 7 }
  0x2a   : > { %430 = vmatpush.bf16.msra.mxu0 %v1454_v0  ;;  %1457 = vmatpush.bf16.msra.mxu1 %v1454_v0  ;;  %v1452_v2 = vld [vmem:[%s1941_s19 + $0x28] sm:$0xff]  ;;  %v1451_v3 = vld [vmem:[%s1941_s19 + $0x20] sm:$0xff]  ;;  %v1450_v4 = vld [vmem:[%s1941_s19 + $0x18] sm:$0xff]  ;;  %s2121_s20 = scalar_lea.vmem [#allocation7], %s1324_s1  ;;  %s2171_s22 = scalar_lea.vmem [#allocation8], %s1324_s1 }
  0x2b   : > { %1458 = vmatpush.bf16.msra.mxu2 %v1454_v0  ;;  %1459 = vmatpush.bf16.msra.mxu3 %v1454_v0  ;;  %v1449_v5 = vld [vmem:[%s1941_s19 + $0x10] sm:$0xff]  ;;  %v1448_v6 = vld [vmem:[%s1941_s19 + $0x8] sm:$0xff]  ;;  %v1447_v7 = vld [vmem:[%s1941_s19] sm:$0xff]  ;;  %s1161_s7 = scalar_lea.hbm %s2715_s2, %s1455_s27  ;;  %s1162_s10 = sshll.u32 %s2121_s20, 4  ;;  %s2643_s10 = int_to_ptr.vmem [resolvable:$true] %s1162_s10 }
  0x2c   : > { %v1431_v8 = vld [vmem:[#allocation5] sm:$0xff]  ;;  %v1432_v12 = vld [vmem:[#allocation5 + $0x8] sm:$0xff]  ;;  %v1433_v16 = vld [vmem:[#allocation5 + $0x10] sm:$0xff]  ;;  %s1164_s24 = sshll.u32 %s1161_s7, 4  ;;  %s1144_s25 = scalar_lea.sflag [#allocation4], %s1937_s6  ;;  %s1165_s24 = int_to_ptr.hbm [resolvable:$true] %s1164_s24 }
  0x2d   : > { %v1435_v9 = vld [vmem:[#allocation5 + $0x20] sm:$0xff]  ;;  %v1436_v13 = vld [vmem:[#allocation5 + $0x28] sm:$0xff]  ;;  %v1437_v17 = vld [vmem:[#allocation5 + $0x30] sm:$0xff]  ;;  %s1701_s26 = sshra.s32 %s1165_s24, 4  ;;  %s1707_s9 = scalar_lea.hbm %s2715_s2, 256  ;;  %s1702_s26 = int_to_ptr.hbm [resolvable:$true] %s1701_s26 }
  0x2e   : > { %431 = vmatpush.bf16.msra.mxu0 %v1453_v1  ;;  %1460 = vmatpush.bf16.msra.mxu1 %v1453_v1  ;;  %v1439_v10 = vld [vmem:[#allocation5 + $0x40] sm:$0xff]  ;;  %v1440_v14 = vld [vmem:[#allocation5 + $0x48] sm:$0xff]  ;;  %v1441_v18 = vld [vmem:[#allocation5 + $0x50] sm:$0xff]  ;;  %s1703_s28 = scalar_lea.hbm %s1702_s26, 128  ;;  %p1708_p10 = scmp.lt.s32.totalorder %s1702_s26, %s2715_s2 }
  0x2f   : > { %1461 = vmatpush.bf16.msra.mxu2 %v1453_v1  ;;  %1462 = vmatpush.bf16.msra.mxu3 %v1453_v1  ;;  %v1443_v11 = vld [vmem:[#allocation5 + $0x60] sm:$0xff]  ;;  %v1444_v15 = vld [vmem:[#allocation5 + $0x68] sm:$0xff]  ;;  %v1445_v19 = vld [vmem:[#allocation5 + $0x70] sm:$0xff]  ;;  %p1704_p1 = scmp.ne.s32.totalorder %s1702_s26, %s1703_s28  ;;  %p1709_p12 = scmp.lt.s32.totalorder %s1707_s9, %s1703_s28 }
  0x30   : > { %v1434_v20 = vld [vmem:[#allocation5 + $0x18] sm:$0xff] }
  0x31   : > { %v1438_v21 = vld [vmem:[#allocation5 + $0x38] sm:$0xff]  ;;  %p1705_p4 = pnand %p1704_p1, %p1914_p5  ;;  %p1710_p13 = por %p1709_p12, %p1708_p10 }
  0x32   : > { %432 = vmatpush.bf16.msra.mxu0 %v1452_v2  ;;  %1463 = vmatpush.bf16.msra.mxu1 %v1452_v2  ;;  %v1442_v22 = vld [vmem:[#allocation5 + $0x58] sm:$0xff] }
  0x33   : > { %1464 = vmatpush.bf16.msra.mxu2 %v1452_v2  ;;  %1465 = vmatpush.bf16.msra.mxu3 %v1452_v2  ;;  %v1446_v23 = vld [vmem:[#allocation5 + $0x78] sm:$0xff]  ;;  %p1706_p8 = pneg %p1705_p4 }
  0x35   : > { %p1711_p0 = pnand %p1710_p13, %p1706_p8 }
  0x36   : > { %433 = vmatpush.bf16.msra.mxu0 %v1451_v3  ;;  %1466 = vmatpush.bf16.msra.mxu1 %v1451_v3 }
  0x37   : > { %1467 = vmatpush.bf16.msra.mxu2 %v1451_v3  ;;  %1468 = vmatpush.bf16.msra.mxu3 %v1451_v3 }
  0x3a   : > { %434 = vmatpush.bf16.msra.mxu0 %v1450_v4  ;;  %1469 = vmatpush.bf16.msra.mxu1 %v1450_v4 }
  0x3b   : > { %1470 = vmatpush.bf16.msra.mxu2 %v1450_v4  ;;  %1471 = vmatpush.bf16.msra.mxu3 %v1450_v4 }
  0x3e   : > { %435 = vmatpush.bf16.msra.mxu0 %v1449_v5  ;;  %1472 = vmatpush.bf16.msra.mxu1 %v1449_v5 }
  0x3f   : > { %1473 = vmatpush.bf16.msra.mxu2 %v1449_v5  ;;  %1474 = vmatpush.bf16.msra.mxu3 %v1449_v5 }
  0x42   : > { %436 = vmatpush.bf16.msra.mxu0 %v1448_v6  ;;  %1475 = vmatpush.bf16.msra.mxu1 %v1448_v6 }
  0x43   : > { %1476 = vmatpush.bf16.msra.mxu2 %v1448_v6  ;;  %1477 = vmatpush.bf16.msra.mxu3 %v1448_v6 }
  0x46   : > { %437 = vmatpush.bf16.msra.mxu0 %v1447_v7  ;;  %1478 = vmatpush.bf16.msra.mxu1 %v1447_v7 }
  0x47   : > { %1479 = vmatpush.bf16.msra.mxu2 %v1447_v7  ;;  %1480 = vmatpush.bf16.msra.mxu3 %v1447_v7 }
  0x49   : > { %438 = vmatmul.bf16.vlgmr.msra.gmra.mxu0 %v1431_v8  ;;  %458 = vmatmul.bf16.vlgmr.msra.gmra.mxu1 %v1435_v9 }
  0x4a   : > { %478 = vmatmul.bf16.vlgmr.msra.gmra.mxu2 %v1439_v10  ;;  %498 = vmatmul.bf16.vlgmr.msra.gmra.mxu3 %v1443_v11 }
  0x59   : > { %443 = vmatmul.bf16.gmra.mxu0 %v1432_v12  ;;  %463 = vmatmul.bf16.gmra.mxu1 %v1436_v13 }
  0x5a   : > { %483 = vmatmul.bf16.gmra.mxu2 %v1440_v14  ;;  %503 = vmatmul.bf16.gmra.mxu3 %v1444_v15 }
  0x69   : > { %448 = vmatmul.bf16.gmra.mxu0 %v1433_v16  ;;  %468 = vmatmul.bf16.gmra.mxu1 %v1437_v17 }
  0x6a   : > { %488 = vmatmul.bf16.gmra.mxu2 %v1441_v18  ;;  %508 = vmatmul.bf16.gmra.mxu3 %v1445_v19 }
  0x79   : > { %453 = vmatmul.bf16.gmra.mxu0 %v1434_v20  ;;  %473 = vmatmul.bf16.gmra.mxu1 %v1438_v21 }
  0x7a   : > { %493 = vmatmul.bf16.gmra.mxu2 %v1442_v22  ;;  %513 = vmatmul.bf16.gmra.mxu3 %v1446_v23 }
  0xc6   : > { %v1959_v24 = vpop.f32.mrf.mxu0  ;;  %v1961_v25 = vpop.f32.mrf.mxu1 }
  0xc7   : > { %v519_v26 = vmul.f32 %v1959_v24, %v1959_v24  ;;  %v1966_v27 = vand.u32 2147483647, %v1959_v24  ;;  %v527_v28 = vmul.f32 %v1961_v25, %v1961_v25  ;;  %v1971_v29 = vand.u32 2147483647, %v1961_v25 }
  0xc8   : > { %vm1031_vm8 = vcmp.lt.f32.partialorder %v1959_v24, 0.0  ;;  %vm1039_vm10 = vcmp.lt.f32.partialorder %v1961_v25, 0.0 }
  0xcd   : > { %v1973_v30 = vpop.f32.mrf.mxu2  ;;  %v1975_v31 = vpop.f32.mrf.mxu3 }
  0xce   : > { %v535_v32 = vmul.f32 %v1973_v30, %v1973_v30  ;;  %v1980_v33 = vand.u32 2147483647, %v1973_v30  ;;  %v543_v34 = vmul.f32 %v1975_v31, %v1975_v31  ;;  %v1985_v35 = vand.u32 2147483647, %v1975_v31  ;;  %v1998_v42 = vpop.f32.mrf.mxu0  ;;  %v2003_v45 = vpop.f32.mrf.mxu1 }
  0xcf   : > { %v520_v46 = vmul.f32 %v1998_v42, %v1998_v42  ;;  %v2009_v47 = vand.u32 2147483647, %v1998_v42  ;;  %v528_v50 = vmul.f32 %v2003_v45, %v2003_v45  ;;  %v2024_v53 = vand.u32 2147483647, %v2003_v45 }
  0xd0   : > { %v1987_v36 = vadd.f32 %v535_v32, %v519_v26  ;;  %v807_v37 = vmax.f32 %v1966_v27, %v1980_v33  ;;  %v1991_v38 = vadd.f32 %v543_v34, %v527_v28  ;;  %v815_v39 = vmax.f32 %v1971_v29, %v1985_v35 }
  0xd1   : > { %v823_v61 = vmin.f32 %v1966_v27, %v1980_v33  ;;  %v831_v2 = vmin.f32 %v1971_v29, %v1985_v35  ;;  %vm983_vm3 = vcmp.gt.f32.partialorder %v1980_v33, %v1966_v27  ;;  %vm991_vm5 = vcmp.gt.f32.partialorder %v1985_v35, %v1971_v29 }
  0xd2   : > { %v1996_v40 = vadd.f32 1e-30, %v1987_v36  ;;  %v839_v41 = vadd.f32 1e-30, %v807_v37  ;;  %v2001_v43 = vadd.f32 1e-30, %v1991_v38 }
  0xd3   : > { %v847_v44 = vadd.f32 1e-30, %v815_v39  ;;  %vm1079_vm13 = vcmp.lt.f32.partialorder %v1973_v30, 0.0 }
  0xd4   : > { %1563 = vrsqrt.f32 %v1996_v40  ;;  %vm589_vm0 = vweird.f32 %v1996_v40  ;;  %vm669_vm1 = vweird.f32 %v2001_v43 }
  0xd5   : > { %1565 = vrcp.f32 %v839_v41  ;;  %v2011_v48 = vpop.f32.mrf.mxu2  ;;  %v2013_v49 = vpop.f32.mrf.mxu3 }
  0xd6   : > { %1567 = vrsqrt.f32 %v2001_v43  ;;  %v536_v51 = vmul.f32 %v2011_v48, %v2011_v48  ;;  %v2021_v52 = vand.u32 2147483647, %v2011_v48  ;;  %v544_v54 = vmul.f32 %v2013_v49, %v2013_v49  ;;  %v2065_v12 = vpop.f32.mrf.mxu0 }
  0xd7   : > { %1569 = vrcp.f32 %v847_v44  ;;  %v2029_v55 = vand.u32 2147483647, %v2013_v49  ;;  %v521_v15 = vmul.f32 %v2065_v12, %v2065_v12  ;;  %v2073_v18 = vand.u32 2147483647, %v2065_v12 }
  0xd8   : > { %v2031_v56 = vadd.f32 %v536_v51, %v520_v46  ;;  %v808_v57 = vmax.f32 %v2009_v47, %v2021_v52  ;;  %v2035_v58 = vadd.f32 %v544_v54, %v528_v50  ;;  %v824_v6 = vmin.f32 %v2009_v47, %v2021_v52 }
  0xd9   : > { %v816_v59 = vmax.f32 %v2024_v53, %v2029_v55  ;;  %v832_v11 = vmin.f32 %v2024_v53, %v2029_v55 }
  0xda   : > { %v2039_v60 = vpop.eup %1563  ;;  %v2044_v62 = vadd.f32 1e-30, %v2031_v56  ;;  %v840_v63 = vadd.f32 1e-30, %v808_v57  ;;  %v2052_v3 = vadd.f32 1e-30, %v2035_v58 }
  0xdb   : > { %v1566_v0 = vpop.eup %1565  ;;  %v584_v1 = vmul.f32 %v2039_v60, %v1996_v40  ;;  %v848_v7 = vadd.f32 1e-30, %v816_v59  ;;  %vm590_vm2 = vweird.f32 %v2039_v60 }
  0xdc   : > { %v2054_v4 = vpop.eup %1567  ;;  %v871_v5 = vmul.f32 %v1566_v0, %v823_v61  ;;  %1571 = vrsqrt.f32 %v2044_v62  ;;  %vm599_vm6 = vweird.f32 %v2044_v62  ;;  %vm591_vm9 = vmor %vm589_vm0, %vm590_vm2  ;;  %vm679_vm12 = vweird.f32 %v2052_v3 }
  0xdd   : > { %v1570_v8 = vpop.eup %1569  ;;  %v585_v9 = vmul.f32 %v2039_v60, %v584_v1  ;;  %v664_v10 = vmul.f32 %v2054_v4, %v2001_v43  ;;  %1573 = vrcp.f32 %v840_v63  ;;  %v2075_v19 = vpop.f32.mrf.mxu2  ;;  %vm670_vm4 = vweird.f32 %v2054_v4 }
  0xde   : > { %v903_v13 = vmul.f32 0.0663, %v871_v5  ;;  %v879_v14 = vmul.f32 %v1570_v8, %v831_v2  ;;  %1575 = vrsqrt.f32 %v2052_v3  ;;  %v887_v20 = vsub.f32 1.0, %v871_v5  ;;  %vm671_vm11 = vmor %vm669_vm1, %vm670_vm4 }
  0xdf   : > { %v586_v16 = vmul.f32 0.5, %v585_v9  ;;  %v665_v17 = vmul.f32 %v2054_v4, %v664_v10  ;;  %1577 = vrcp.f32 %v848_v7  ;;  %v537_v39 = vmul.f32 %v2075_v19, %v2075_v19 }
  0xe0   : > { %v919_v21 = vadd.f32 0.2447, %v903_v13  ;;  %v911_v22 = vmul.f32 0.0663, %v879_v14  ;;  %v895_v28 = vsub.f32 1.0, %v879_v14  ;;  %vm1087_vm0 = vcmp.lt.f32.partialorder %v1975_v31, 0.0 }
  0xe1   : > { %v587_v23 = vsub.f32 1.5, %v586_v16  ;;  %v666_v26 = vmul.f32 0.5, %v665_v17  ;;  %v2086_v41 = vand.u32 2147483647, %v2075_v19  ;;  %v2102_v63 = vadd.f32 %v537_v39, %v521_v15 }
  0xe2   : > { %v2080_v32 = vpop.eup %1571  ;;  %v935_v34 = vmul.f32 %v919_v21, %v887_v20  ;;  %v927_v37 = vadd.f32 0.2447, %v911_v22  ;;  %vm984_vm2 = vcmp.gt.f32.partialorder %v2021_v52, %v2009_v47  ;;  %vm1040_vm4 = vcmp.lt.f32.partialorder %v2003_v45, 0.0 }
  0xe3   : > { %v1574_v44 = vpop.eup %1573  ;;  %v588_v46 = vmul.f32 %v2039_v60, %v587_v23  ;;  %v667_v50 = vsub.f32 1.5, %v666_v26  ;;  %v594_v51 = vmul.f32 %v2080_v32, %v2044_v62  ;;  %vm600_vm7 = vweird.f32 %v2080_v32 }
  0xe4   : > { %v2095_v54 = vpop.eup %1575  ;;  %v951_v57 = vadd.f32 0.7853982, %v935_v34  ;;  %v943_v59 = vmul.f32 %v927_v37, %v895_v28  ;;  %v872_v61 = vmul.f32 %v1574_v44, %v824_v6  ;;  %v2134_v26 = vadd.f32 1e-30, %v2102_v63  ;;  %vm601_vm15 = vmor %vm599_vm6, %vm600_vm7 }
  0xe5   : > { %v592_v0 = vsel %vm591_vm9, %v2039_v60, %v588_v46  ;;  %v668_v1 = vmul.f32 %v2054_v4, %v667_v50  ;;  %v595_v2 = vmul.f32 %v2080_v32, %v594_v51  ;;  %v674_v7 = vmul.f32 %v2095_v54, %v2052_v3  ;;  %v1578_v8 = vpop.eup %1577 }
  0xe6   : > { %v743_v40 = vmul.f32 %v592_v0, %v1987_v36  ;;  %v967_v9 = vmul.f32 %v951_v57, %v871_v5  ;;  %v959_v60 = vadd.f32 0.7853982, %v943_v59  ;;  %v888_v6 = vsub.f32 1.0, %v872_v61  ;;  %v2152_v57 = vpop.f32.mrf.mxu1 }
  0xe7   : > { %v672_v10 = vsel %vm671_vm11, %v2054_v4, %v668_v1  ;;  %v596_v13 = vmul.f32 0.5, %v595_v2  ;;  %v904_v15 = vmul.f32 0.0663, %v872_v61  ;;  %v675_v16 = vmul.f32 %v2095_v54, %v674_v7 }
  0xe8   : > { %759 = vst [vmem:[%s2121_s20] sm:$0xff] %v743_v40  ;;  %v999_v36 = vsub.f32 1.5707964, %v967_v9  ;;  %v751_v43 = vmul.f32 %v672_v10, %v1991_v38  ;;  %v975_v5 = vmul.f32 %v959_v60, %v879_v14  ;;  %vm680_vm14 = vweird.f32 %v2095_v54 }
  0xe9   : > { %v597_v17 = vsub.f32 1.5, %v596_v13  ;;  %v920_v20 = vadd.f32 0.2447, %v904_v15  ;;  %v676_v21 = vmul.f32 0.5, %v675_v16  ;;  %v880_v4 = vmul.f32 %v1578_v8, %v832_v11  ;;  %vm681_vm1 = vmor %vm679_vm12, %vm680_vm14 }
  0xea   : > { %v1015_v22 = vsel %vm983_vm3, %v999_v36, %v967_v9  ;;  %767 = vst [vmem:[%s2121_s20 + $0x40] sm:$0xff] %v751_v43  ;;  %v1007_v23 = vsub.f32 1.5707964, %v975_v5  ;;  %v809_v38 = vmax.f32 %v2073_v18, %v2086_v41  ;;  %1579 = vrsqrt.f32 %v2134_v26 }
  0xeb   : > { %v1047_v14 = vsub.f32 3.1415927, %v1015_v22  ;;  %v598_v28 = vmul.f32 %v2080_v32, %v597_v17  ;;  %v936_v34 = vmul.f32 %v920_v20, %v888_v6  ;;  %v677_v37 = vsub.f32 1.5, %v676_v21 }
  0xec   : > { %v1023_v11 = vsel %vm991_vm5, %v1007_v23, %v975_v5  ;;  %v896_v27 = vsub.f32 1.0, %v880_v4  ;;  %v912_v33 = vmul.f32 0.0663, %v880_v4  ;;  %v841_v30 = vadd.f32 1e-30, %v809_v38  ;;  %v2203_v5 = vpop.f32.mrf.mxu0 }
  0xed   : > { %v1063_v39 = vsel %vm1031_vm8, %v1047_v14, %v1015_v22  ;;  %v1055_v44 = vsub.f32 3.1415927, %v1023_v11  ;;  %v602_v46 = vsel %vm601_vm15, %v2080_v32, %v598_v28  ;;  %v952_v50 = vadd.f32 0.7853982, %v936_v34 }
  0xee   : > { %v1095_v51 = vsub.f32 0.0, %v1063_v39  ;;  %v744_v29 = vmul.f32 %v602_v46, %v2031_v56  ;;  %v678_v35 = vmul.f32 %v2095_v54, %v677_v37  ;;  %v928_v62 = vadd.f32 0.2447, %v912_v33  ;;  %v2163_v56 = vpop.f32.mrf.mxu3 }
  0xef   : > { %v1071_v59 = vsel %vm1039_vm10, %v1055_v44, %v1023_v11  ;;  %v968_v24 = vmul.f32 %v952_v50, %v872_v61  ;;  %v529_v32 = vmul.f32 %v2152_v57, %v2152_v57  ;;  %v2180_v40 = vand.u32 2147483647, %v2152_v57 }
  0xf0   : > { %v1111_v0 = vsel %vm1079_vm13, %v1095_v51, %v1063_v39  ;;  %v1103_v1 = vsub.f32 0.0, %v1071_v59  ;;  %760 = vst [vmem:[%s2121_s20 + $0x8] sm:$0xff] %v744_v29  ;;  %v682_v25 = vsel %vm681_vm1, %v2095_v54, %v678_v35  ;;  %v944_v2 = vmul.f32 %v928_v62, %v896_v27  ;;  %v1580_v7 = vpop.eup %1579 }
  0xf1   : > { %1127 = vst [vmem:[%s2171_s22] sm:$0xff] %v1111_v0  ;;  %v1000_v3 = vsub.f32 1.5707964, %v968_v24  ;;  %v752_v61 = vmul.f32 %v682_v25, %v2035_v58  ;;  %v545_v9 = vmul.f32 %v2163_v56, %v2163_v56  ;;  %v604_v6 = vmul.f32 %v1580_v7, %v2134_v26 }
  0xf2   : > { %v1119_v8 = vsel %vm1087_vm0, %v1103_v1, %v1071_v59  ;;  %v960_v54 = vadd.f32 0.7853982, %v944_v2  ;;  %1581 = vrcp.f32 %v841_v30  ;;  %v2190_v31 = vand.u32 2147483647, %v2163_v56 }
  0xf3   : > { %1135 = vst [vmem:[%s2171_s22 + $0x40] sm:$0xff] %v1119_v8  ;;  %v1016_v60 = vsel %vm984_vm2, %v1000_v3, %v968_v24  ;;  %v2187_v58 = vadd.f32 %v545_v9, %v529_v32  ;;  %vm1032_vm3 = vcmp.lt.f32.partialorder %v1998_v42, 0.0  ;;  %vm1080_vm5 = vcmp.lt.f32.partialorder %v2011_v48, 0.0 }
  0xf4   : > { %v1048_v47 = vsub.f32 3.1415927, %v1016_v60  ;;  %768 = vst [vmem:[%s2121_s20 + $0x48] sm:$0xff] %v752_v61  ;;  %v976_v52 = vmul.f32 %v960_v54, %v880_v4  ;;  %v605_v10 = vmul.f32 %v1580_v7, %v604_v6  ;;  %v817_v36 = vmax.f32 %v2180_v40, %v2190_v31  ;;  %v2208_v4 = vpop.f32.mrf.mxu2 }
  0xf5   : > { %v2196_v16 = vadd.f32 1e-30, %v2187_v58  ;;  %vm992_vm6 = vcmp.gt.f32.partialorder %v2029_v55, %v2024_v53  ;;  %vm1088_vm7 = vcmp.lt.f32.partialorder %v2013_v49, 0.0  ;;  %v825_v20 = vmin.f32 %v2073_v18, %v2086_v41  ;;  %v2212_v55 = vpop.f32.mrf.mxu1 }
  0xf6   : > { %v1064_v13 = vsel %vm1032_vm3, %v1048_v47, %v1016_v60  ;;  %v1008_v15 = vsub.f32 1.5707964, %v976_v52  ;;  %v606_v42 = vmul.f32 0.5, %v605_v10  ;;  %v849_v21 = vadd.f32 1e-30, %v817_v36  ;;  %v2218_v34 = vpop.f32.mrf.mxu3 }
  0xf7   : > { %v1096_v43 = vsub.f32 0.0, %v1064_v13  ;;  %1583 = vrsqrt.f32 %v2196_v16  ;;  %vm610_vm8 = vweird.f32 %v1580_v7  ;;  %vm609_vm9 = vweird.f32 %v2134_v26 }
  0xf8   : > { %v1024_v17 = vsel %vm992_vm6, %v1008_v15, %v976_v52  ;;  %v1582_v22 = vpop.eup %1581  ;;  %v607_v53 = vsub.f32 1.5, %v606_v42  ;;  %1585 = vrcp.f32 %v849_v21  ;;  %v522_v28 = vmul.f32 %v2203_v5, %v2203_v5  ;;  %vm611_vm10 = vmor %vm609_vm9, %vm610_vm8 }
  0xf9   : > { %v1112_v23 = vsel %vm1080_vm5, %v1096_v43, %v1064_v13  ;;  %v1056_v38 = vsub.f32 3.1415927, %v1024_v17  ;;  %v873_v14 = vmul.f32 %v1582_v22, %v825_v20  ;;  %v2223_v11 = vand.u32 2147483647, %v2203_v5 }
  0xfa   : > { %1128 = vst [vmem:[%s2171_s22 + $0x8] sm:$0xff] %v1112_v23  ;;  %v608_v48 = vmul.f32 %v1580_v7, %v607_v53  ;;  %v538_v27 = vmul.f32 %v2208_v4, %v2208_v4  ;;  %v530_v39 = vmul.f32 %v2212_v55, %v2212_v55  ;;  %v2230_v44 = vand.u32 2147483647, %v2208_v4 }
  0xfb   : > { %v1072_v37 = vsel %vm1040_vm4, %v1056_v38, %v1024_v17  ;;  %v905_v26 = vmul.f32 0.0663, %v873_v14  ;;  %v889_v46 = vsub.f32 1.0, %v873_v14  ;;  %v546_v51 = vmul.f32 %v2218_v34, %v2218_v34 }
  0xfc   : > { %v1104_v33 = vsub.f32 0.0, %v1072_v37  ;;  %v612_v45 = vsel %vm611_vm10, %v1580_v7, %v608_v48  ;;  %v2232_v50 = vadd.f32 %v538_v27, %v522_v28  ;;  %v810_v24 = vmax.f32 %v2223_v11, %v2230_v44 }
  0xfd   : > { %v1584_v29 = vpop.eup %1583  ;;  %v745_v62 = vmul.f32 %v612_v45, %v2102_v63  ;;  %v921_v59 = vadd.f32 0.2447, %v905_v26  ;;  %v833_v0 = vmin.f32 %v2180_v40, %v2190_v31  ;;  %v2249_v3 = vadd.f32 %v546_v51, %v530_v39  ;;  %v2295_v26 = vpop.f32.mrf.mxu1 }
  0xfe   : > { %v1120_v35 = vsel %vm1088_vm7, %v1104_v33, %v1072_v37  ;;  %v684_v32 = vmul.f32 %v1584_v29, %v2196_v16  ;;  %v2246_v1 = vadd.f32 1e-30, %v2232_v50  ;;  %v1586_v25 = vpop.eup %1585  ;;  %v842_v49 = vadd.f32 1e-30, %v810_v24  ;;  %v2284_v37 = vpop.f32.mrf.mxu0 }
  0xff   : > { %1136 = vst [vmem:[%s2171_s22 + $0x48] sm:$0xff] %v1120_v35  ;;  %v937_v2 = vmul.f32 %v921_v59, %v889_v46  ;;  %v881_v61 = vmul.f32 %v1586_v25, %v833_v0  ;;  %v2252_v30 = vand.u32 2147483647, %v2212_v55  ;;  %v2256_v8 = vadd.f32 1e-30, %v2249_v3  ;;  %v2297_v39 = vpop.f32.mrf.mxu2 }
 0x100   : > { %761 = vst [vmem:[%s2121_s20 + $0x10] sm:$0xff] %v745_v62  ;;  %v685_v63 = vmul.f32 %v1584_v29, %v684_v32  ;;  %1587 = vrsqrt.f32 %v2246_v1  ;;  %v2259_v54 = vand.u32 2147483647, %v2218_v34  ;;  %vm1033_vm11 = vcmp.lt.f32.partialorder %v2065_v12, 0.0 }
 0x101   : > { %v953_v7 = vadd.f32 0.7853982, %v937_v2  ;;  %1589 = vrcp.f32 %v842_v49  ;;  %v913_v60 = vmul.f32 0.0663, %v881_v61  ;;  %vm985_vm12 = vcmp.gt.f32.partialorder %v2086_v41, %v2073_v18 }
 0x102   : > { %v686_v9 = vmul.f32 0.5, %v685_v63  ;;  %1591 = vrsqrt.f32 %v2256_v8  ;;  %v818_v47 = vmax.f32 %v2252_v30, %v2259_v54  ;;  %vm690_vm13 = vweird.f32 %v1584_v29 }
 0x103   : > { %v969_v6 = vmul.f32 %v953_v7, %v873_v14  ;;  %v897_v10 = vsub.f32 1.0, %v881_v61  ;;  %v929_v13 = vadd.f32 0.2447, %v913_v60  ;;  %vm1081_vm14 = vcmp.lt.f32.partialorder %v2075_v19, 0.0 }
 0x104   : > { %v687_v52 = vsub.f32 1.5, %v686_v9  ;;  %vm993_vm15 = vcmp.gt.f32.partialorder %v2190_v31, %v2180_v40  ;;  %v850_v36 = vadd.f32 1e-30, %v818_v47  ;;  %vm689_vm0 = vweird.f32 %v2196_v16 }
 0x105   : > { %v1001_v15 = vsub.f32 1.5707964, %v969_v6  ;;  %v945_v17 = vmul.f32 %v929_v13, %v897_v10  ;;  %v826_v20 = vmin.f32 %v2223_v11, %v2230_v44  ;;  %vm691_vm1 = vmor %vm689_vm0, %vm690_vm13  ;;  %vm619_vm2 = vweird.f32 %v2246_v1 }
 0x106   : > { %v2270_v43 = vpop.eup %1587  ;;  %v688_v42 = vmul.f32 %v1584_v29, %v687_v52  ;;  %v834_v38 = vmin.f32 %v2252_v30, %v2259_v54  ;;  %1593 = vrcp.f32 %v850_v36  ;;  %vm1041_vm3 = vcmp.lt.f32.partialorder %v2152_v57, 0.0 }
 0x107   : > { %v1590_v21 = vpop.eup %1589  ;;  %v1017_v22 = vsel %vm985_vm12, %v1001_v15, %v969_v6  ;;  %v614_v23 = vmul.f32 %v2270_v43, %v2246_v1  ;;  %v961_v14 = vadd.f32 0.7853982, %v945_v17  ;;  %v523_v27 = vmul.f32 %v2284_v37, %v2284_v37 }
 0x108   : > { %v1049_v16 = vsub.f32 3.1415927, %v1017_v22  ;;  %v692_v53 = vsel %vm691_vm1, %v1584_v29, %v688_v42  ;;  %v874_v28 = vmul.f32 %v1590_v21, %v826_v20  ;;  %v2286_v18 = vpop.eup %1591  ;;  %v2293_v33 = vand.u32 2147483647, %v2284_v37 }
 0x109   : > { %v753_v41 = vmul.f32 %v692_v53, %v2187_v58  ;;  %v615_v48 = vmul.f32 %v2270_v43, %v614_v23  ;;  %v977_v46 = vmul.f32 %v961_v14, %v881_v61  ;;  %v531_v58 = vmul.f32 %v2295_v26, %v2295_v26 }
 0x10a   : > { %v1065_v45 = vsel %vm1033_vm11, %v1049_v16, %v1017_v22  ;;  %v906_v51 = vmul.f32 0.0663, %v874_v28  ;;  %vm1089_vm4 = vcmp.lt.f32.partialorder %v2163_v56, 0.0  ;;  %v890_v62 = vsub.f32 1.0, %v874_v28  ;;  %v2336_v22 = vpop.f32.mrf.mxu3 }
 0x10b   : > { %v1097_v29 = vsub.f32 0.0, %v1065_v45  ;;  %769 = vst [vmem:[%s2121_s20 + $0x50] sm:$0xff] %v753_v41  ;;  %v616_v35 = vmul.f32 0.5, %v615_v48  ;;  %v694_v59 = vmul.f32 %v2286_v18, %v2256_v8  ;;  %vm699_vm5 = vweird.f32 %v2256_v8 }
 0x10c   : > { %v1009_v24 = vsub.f32 1.5707964, %v977_v46  ;;  %v922_v12 = vadd.f32 0.2447, %v906_v51  ;;  %v539_v32 = vmul.f32 %v2297_v39, %v2297_v39  ;;  %v2311_v0 = vand.u32 2147483647, %v2297_v39  ;;  %v1594_v25 = vpop.eup %1593 }
 0x10d   : > { %v1113_v2 = vsel %vm1081_vm14, %v1097_v29, %v1065_v45  ;;  %v617_v49 = vsub.f32 1.5, %v616_v35  ;;  %vm620_vm6 = vweird.f32 %v2270_v43  ;;  %v695_v63 = vmul.f32 %v2286_v18, %v694_v59 }
 0x10e   : > { %1129 = vst [vmem:[%s2171_s22 + $0x10] sm:$0xff] %v1113_v2  ;;  %v1025_v61 = vsel %vm993_vm15, %v1009_v24, %v977_v46  ;;  %v938_v7 = vmul.f32 %v922_v12, %v890_v62  ;;  %v882_v9 = vmul.f32 %v1594_v25, %v834_v38  ;;  %v2321_v60 = vadd.f32 %v539_v32, %v523_v27  ;;  %vm621_vm7 = vmor %vm619_vm2, %vm620_vm6  ;;  %v2368_v27 = vpop.f32.mrf.mxu0  ;;  %v2377_v62 = vpop.f32.mrf.mxu2 }
 0x10f   : > { %v1057_v6 = vsub.f32 3.1415927, %v1025_v61  ;;  %v618_v47 = vmul.f32 %v2270_v43, %v617_v49  ;;  %v696_v52 = vmul.f32 0.5, %v695_v63  ;;  %v811_v19 = vmax.f32 %v2293_v33, %v2311_v0  ;;  %v2387_v32 = vpop.f32.mrf.mxu1 }
 0x110   : > { %v954_v10 = vadd.f32 0.7853982, %v938_v7  ;;  %vm700_vm8 = vweird.f32 %v2286_v18  ;;  %v898_v13 = vsub.f32 1.0, %v882_v9  ;;  %v914_v40 = vmul.f32 0.0663, %v882_v9 }
 0x111   : > { %v1073_v31 = vsel %vm1041_vm3, %v1057_v6, %v1025_v61  ;;  %v622_v15 = vsel %vm621_vm7, %v2270_v43, %v618_v47  ;;  %v697_v36 = vsub.f32 1.5, %v696_v52  ;;  %v2333_v42 = vadd.f32 1e-30, %v2321_v60  ;;  %vm701_vm10 = vmor %vm699_vm5, %vm700_vm8 }
 0x112   : > { %v1105_v17 = vsub.f32 0.0, %v1073_v31  ;;  %v746_v1 = vmul.f32 %v622_v15, %v2232_v50  ;;  %v970_v20 = vmul.f32 %v954_v10, %v874_v28  ;;  %v930_v21 = vadd.f32 0.2447, %v914_v40  ;;  %v2391_v61 = vpop.f32.mrf.mxu3 }
 0x113   : > { %v698_v23 = vmul.f32 %v2286_v18, %v697_v36  ;;  %v2340_v38 = vand.u32 2147483647, %v2295_v26  ;;  %1595 = vrsqrt.f32 %v2333_v42  ;;  %v843_v57 = vadd.f32 1e-30, %v811_v19 }
 0x114   : > { %v1121_v43 = vsel %vm1089_vm4, %v1105_v17, %v1073_v31  ;;  %762 = vst [vmem:[%s2121_s20 + $0x18] sm:$0xff] %v746_v1  ;;  %vm986_vm9 = vcmp.gt.f32.partialorder %v2230_v44, %v2223_v11  ;;  %v1002_v50 = vsub.f32 1.5707964, %v970_v20  ;;  %v946_v16 = vmul.f32 %v930_v21, %v898_v13 }
 0x115   : > { %1137 = vst [vmem:[%s2171_s22 + $0x50] sm:$0xff] %v1121_v43  ;;  %v702_v53 = vsel %vm701_vm10, %v2286_v18, %v698_v23  ;;  %1597 = vrcp.f32 %v843_v57  ;;  %v547_v56 = vmul.f32 %v2336_v22, %v2336_v22  ;;  %v2357_v14 = vand.u32 2147483647, %v2336_v22 }
 0x116   : > { %v1018_v28 = vsel %vm986_vm9, %v1002_v50, %v970_v20  ;;  %v754_v11 = vmul.f32 %v702_v53, %v2249_v3  ;;  %v962_v44 = vadd.f32 0.7853982, %v946_v16  ;;  %vm1034_vm11 = vcmp.lt.f32.partialorder %v2203_v5, 0.0 }
 0x117   : > { %v1050_v41 = vsub.f32 3.1415927, %v1018_v28  ;;  %v2360_v48 = vadd.f32 %v547_v56, %v531_v58  ;;  %v819_v8 = vmax.f32 %v2340_v38, %v2357_v14  ;;  %vm1042_vm12 = vcmp.lt.f32.partialorder %v2212_v55, 0.0 }
 0x118   : > { %vm1082_vm13 = vcmp.lt.f32.partialorder %v2208_v4, 0.0  ;;  %770 = vst [vmem:[%s2121_s20 + $0x58] sm:$0xff] %v754_v11  ;;  %v978_v18 = vmul.f32 %v962_v44, %v882_v9  ;;  %vm1090_vm14 = vcmp.lt.f32.partialorder %v2218_v34, 0.0  ;;  %v827_v35 = vmin.f32 %v2293_v33, %v2311_v0 }
 0x119   : > { %v1596_v45 = vpop.eup %1595  ;;  %v1066_v46 = vsel %vm1034_vm11, %v1050_v41, %v1018_v28  ;;  %v2372_v3 = vadd.f32 1e-30, %v2360_v48  ;;  %v851_v51 = vadd.f32 1e-30, %v819_v8  ;;  %vm994_vm15 = vcmp.gt.f32.partialorder %v2259_v54, %v2252_v30 }
 0x11a   : > { %v1098_v58 = vsub.f32 0.0, %v1066_v46  ;;  %v1010_v29 = vsub.f32 1.5707964, %v978_v18  ;;  %v624_v5 = vmul.f32 %v1596_v45, %v2333_v42  ;;  %v524_v24 = vmul.f32 %v2368_v27, %v2368_v27 }
 0x11b   : > { %v1598_v59 = vpop.eup %1597  ;;  %1599 = vrsqrt.f32 %v2372_v3  ;;  %v2385_v12 = vand.u32 2147483647, %v2368_v27  ;;  %vm630_vm0 = vweird.f32 %v1596_v45  ;;  %v540_v54 = vmul.f32 %v2377_v62, %v2377_v62 }
 0x11c   : > { %v1114_v25 = vsel %vm1082_vm13, %v1098_v58, %v1066_v46  ;;  %v1026_v2 = vsel %vm994_vm15, %v1010_v29, %v978_v18  ;;  %v625_v49 = vmul.f32 %v1596_v45, %v624_v5  ;;  %v875_v63 = vmul.f32 %v1598_v59, %v827_v35 }
 0x11d   : > { %1130 = vst [vmem:[%s2171_s22 + $0x18] sm:$0xff] %v1114_v25  ;;  %v1058_v30 = vsub.f32 3.1415927, %v1026_v2  ;;  %1601 = vrcp.f32 %v851_v51  ;;  %v532_v6 = vmul.f32 %v2387_v32, %v2387_v32  ;;  %v2399_v4 = vand.u32 2147483647, %v2377_v62 }
 0x11e   : > { %v626_v7 = vmul.f32 0.5, %v625_v49  ;;  %v907_v9 = vmul.f32 0.0663, %v875_v63  ;;  %v891_v52 = vsub.f32 1.0, %v875_v63  ;;  %v2403_v19 = vadd.f32 %v540_v54, %v524_v24  ;;  %v2454_v54 = vpop.f32.mrf.mxu0 }
 0x11f   : > { %v1074_v47 = vsel %vm1042_vm12, %v1058_v30, %v1026_v2  ;;  %v548_v10 = vmul.f32 %v2391_v61, %v2391_v61  ;;  %v812_v15 = vmax.f32 %v2385_v12, %v2399_v4  ;;  %vm629_vm1 = vweird.f32 %v2333_v42 }
 0x120   : > { %v1106_v13 = vsub.f32 0.0, %v1074_v47  ;;  %v627_v40 = vsub.f32 1.5, %v626_v7  ;;  %v923_v31 = vadd.f32 0.2447, %v907_v9  ;;  %v835_v55 = vmin.f32 %v2340_v38, %v2357_v14  ;;  %vm631_vm2 = vmor %vm629_vm1, %vm630_vm0 }
 0x121   : > { %v1600_v36 = vpop.eup %1599  ;;  %v2413_v17 = vadd.f32 1e-30, %v2403_v19  ;;  %v2415_v1 = vadd.f32 %v548_v10, %v532_v6  ;;  %v2423_v42 = vand.u32 2147483647, %v2387_v32  ;;  %v844_v50 = vadd.f32 1e-30, %v812_v15  ;;  %v2465_v10 = vpop.f32.mrf.mxu2 }
 0x122   : > { %v1122_v20 = vsel %vm1090_vm14, %v1106_v13, %v1074_v47  ;;  %v628_v21 = vmul.f32 %v1596_v45, %v627_v40  ;;  %v939_v23 = vmul.f32 %v923_v31, %v891_v52  ;;  %v704_v57 = vmul.f32 %v1600_v36, %v2372_v3 }
 0x123   : > { %v1602_v43 = vpop.eup %1601  ;;  %1138 = vst [vmem:[%s2171_s22 + $0x58] sm:$0xff] %v1122_v20  ;;  %1603 = vrsqrt.f32 %v2413_v17  ;;  %v2428_v11 = vadd.f32 1e-30, %v2415_v1  ;;  %v2431_v44 = vand.u32 2147483647, %v2391_v61  ;;  %vm1035_vm3 = vcmp.lt.f32.partialorder %v2284_v37, 0.0 }
 0x124   : > { %v632_v16 = vsel %vm631_vm2, %v1596_v45, %v628_v21  ;;  %v955_v53 = vadd.f32 0.7853982, %v939_v23  ;;  %v705_v56 = vmul.f32 %v1600_v36, %v704_v57  ;;  %v883_v34 = vmul.f32 %v1602_v43, %v835_v55 }
 0x125   : > { %v747_v28 = vmul.f32 %v632_v16, %v2321_v60  ;;  %1605 = vrcp.f32 %v844_v50  ;;  %vm1083_vm4 = vcmp.lt.f32.partialorder %v2297_v39, 0.0  ;;  %vm710_vm5 = vweird.f32 %v1600_v36 }
 0x126   : > { %v971_v41 = vmul.f32 %v955_v53, %v875_v63  ;;  %v706_v8 = vmul.f32 0.5, %v705_v56  ;;  %v915_v18 = vmul.f32 0.0663, %v883_v34  ;;  %1607 = vrsqrt.f32 %v2428_v11 }
 0x127   : > { %763 = vst [vmem:[%s2121_s20 + $0x20] sm:$0xff] %v747_v28  ;;  %v820_v60 = vmax.f32 %v2423_v42, %v2431_v44  ;;  %v899_v51 = vsub.f32 1.0, %v883_v34  ;;  %vm987_vm6 = vcmp.gt.f32.partialorder %v2311_v0, %v2293_v33  ;;  %vm709_vm7 = vweird.f32 %v2372_v3 }
 0x128   : > { %v1003_v45 = vsub.f32 1.5707964, %v971_v41  ;;  %v707_v46 = vsub.f32 1.5, %v706_v8  ;;  %v931_v58 = vadd.f32 0.2447, %v915_v18  ;;  %v828_v5 = vmin.f32 %v2385_v12, %v2399_v4  ;;  %vm711_vm8 = vmor %vm709_vm7, %vm710_vm5 }
 0x129   : > { %v2439_v29 = vpop.eup %1603  ;;  %v852_v35 = vadd.f32 1e-30, %v820_v60  ;;  %vm995_vm9 = vcmp.gt.f32.partialorder %v2357_v14, %v2340_v38  ;;  %vm639_vm10 = vweird.f32 %v2413_v17  ;;  %vm1043_vm11 = vcmp.lt.f32.partialorder %v2295_v26, 0.0 }
 0x12a   : > { %v1019_v59 = vsel %vm987_vm6, %v1003_v45, %v971_v41  ;;  %v708_v24 = vmul.f32 %v1600_v36, %v707_v46  ;;  %v947_v25 = vmul.f32 %v931_v58, %v899_v51  ;;  %v634_v2 = vmul.f32 %v2439_v29, %v2413_v17 }
 0x12b   : > { %v1606_v49 = vpop.eup %1605  ;;  %v1051_v63 = vsub.f32 3.1415927, %v1019_v59  ;;  %1609 = vrcp.f32 %v852_v35  ;;  %v836_v47 = vmin.f32 %v2423_v42, %v2431_v44  ;;  %v525_v52 = vmul.f32 %v2454_v54, %v2454_v54  ;;  %v2509_v35 = vpop.f32.mrf.mxu3 }
 0x12c   : > { %v712_v33 = vsel %vm711_vm8, %v1600_v36, %v708_v24  ;;  %v963_v0 = vadd.f32 0.7853982, %v947_v25  ;;  %v635_v3 = vmul.f32 %v2439_v29, %v634_v2  ;;  %v876_v30 = vmul.f32 %v1606_v49, %v828_v5  ;;  %v2456_v7 = vpop.eup %1607  ;;  %v2470_v36 = vpop.f32.mrf.mxu1 }
 0x12d   : > { %v1067_v9 = vsel %vm1035_vm3, %v1051_v63, %v1019_v59  ;;  %v755_v6 = vmul.f32 %v712_v33, %v2360_v48  ;;  %v2468_v15 = vand.u32 2147483647, %v2454_v54  ;;  %vm1091_vm12 = vcmp.lt.f32.partialorder %v2336_v22, 0.0 }
 0x12e   : > { %v1099_v13 = vsub.f32 0.0, %v1067_v9  ;;  %v979_v40 = vmul.f32 %v963_v0, %v883_v34  ;;  %v636_v31 = vmul.f32 0.5, %v635_v3  ;;  %vm640_vm13 = vweird.f32 %v2439_v29 }
 0x12f   : > { %771 = vst [vmem:[%s2121_s20 + $0x60] sm:$0xff] %v755_v6  ;;  %v908_v37 = vmul.f32 0.0663, %v876_v30  ;;  %v714_v48 = vmul.f32 %v2456_v7, %v2428_v11  ;;  %vm719_vm14 = vweird.f32 %v2428_v11  ;;  %v533_v55 = vmul.f32 %v2470_v36, %v2470_v36  ;;  %vm641_vm15 = vmor %vm639_vm10, %vm640_vm13 }
 0x130   : > { %v1115_v20 = vsel %vm1083_vm4, %v1099_v13, %v1067_v9  ;;  %v1011_v21 = vsub.f32 1.5707964, %v979_v40  ;;  %v637_v23 = vsub.f32 1.5, %v636_v31  ;;  %v541_v57 = vmul.f32 %v2465_v10, %v2465_v10 }
 0x131   : > { %v1610_v43 = vpop.eup %1609  ;;  %1131 = vst [vmem:[%s2171_s22 + $0x20] sm:$0xff] %v1115_v20  ;;  %v892_v50 = vsub.f32 1.0, %v876_v30  ;;  %v924_v16 = vadd.f32 0.2447, %v908_v37  ;;  %v715_v53 = vmul.f32 %v2456_v7, %v714_v48  ;;  %v2487_v56 = vand.u32 2147483647, %v2465_v10 }
 0x132   : > { %v1027_v34 = vsel %vm995_vm9, %v1011_v21, %v979_v40  ;;  %v638_v39 = vmul.f32 %v2439_v29, %v637_v23  ;;  %v884_v28 = vmul.f32 %v1610_v43, %v836_v47  ;;  %v2493_v41 = vadd.f32 %v541_v57, %v525_v52  ;;  %v2552_v21 = vpop.f32.mrf.mxu2 }
 0x133   : > { %v1059_v8 = vsub.f32 3.1415927, %v1027_v34  ;;  %v940_v18 = vmul.f32 %v924_v16, %v892_v50  ;;  %v716_v60 = vmul.f32 0.5, %v715_v53  ;;  %v813_v45 = vmax.f32 %v2468_v15, %v2487_v56 }
 0x134   : > { %v642_v38 = vsel %vm641_vm15, %v2439_v29, %v638_v39  ;;  %vm720_vm0 = vweird.f32 %v2456_v7  ;;  %v916_v14 = vmul.f32 0.0663, %v884_v28  ;;  %v2504_v46 = vadd.f32 1e-30, %v2493_v41 }
 0x135   : > { %v1075_v51 = vsel %vm1043_vm11, %v1059_v8, %v1027_v34  ;;  %v748_v17 = vmul.f32 %v642_v38, %v2403_v19  ;;  %v956_v58 = vadd.f32 0.7853982, %v940_v18  ;;  %v717_v5 = vsub.f32 1.5, %v716_v60  ;;  %vm721_vm1 = vmor %vm719_vm14, %vm720_vm0  ;;  %v2570_v8 = vpop.f32.mrf.mxu3 }
 0x136   : > { %v1107_v59 = vsub.f32 0.0, %v1075_v51  ;;  %v900_v24 = vsub.f32 1.0, %v884_v28  ;;  %v932_v25 = vadd.f32 0.2447, %v916_v14  ;;  %1611 = vrsqrt.f32 %v2504_v46 }
 0x137   : > { %764 = vst [vmem:[%s2121_s20 + $0x28] sm:$0xff] %v748_v17  ;;  %v972_v29 = vmul.f32 %v956_v58, %v876_v30  ;;  %v718_v2 = vmul.f32 %v2456_v7, %v717_v5  ;;  %v2515_v49 = vand.u32 2147483647, %v2470_v36  ;;  %v845_v26 = vadd.f32 1e-30, %v813_v45 }
 0x138   : > { %v1123_v19 = vsel %vm1091_vm12, %v1107_v59, %v1075_v51  ;;  %v948_v63 = vmul.f32 %v932_v25, %v900_v24  ;;  %v549_v33 = vmul.f32 %v2509_v35, %v2509_v35  ;;  %v2528_v30 = vand.u32 2147483647, %v2509_v35  ;;  %v2574_v51 = vpop.f32.mrf.mxu1 }
 0x139   : > { %1139 = vst [vmem:[%s2171_s22 + $0x60] sm:$0xff] %v1123_v19  ;;  %v1004_v0 = vsub.f32 1.5707964, %v972_v29  ;;  %v722_v3 = vsel %vm721_vm1, %v2456_v7, %v718_v2  ;;  %1613 = vrcp.f32 %v845_v26  ;;  %vm988_vm2 = vcmp.gt.f32.partialorder %v2399_v4, %v2385_v12 }
 0x13a   : > { %v756_v22 = vmul.f32 %v722_v3, %v2415_v1  ;;  %v964_v11 = vadd.f32 0.7853982, %v948_v63  ;;  %v2533_v9 = vadd.f32 %v549_v33, %v533_v55  ;;  %v821_v47 = vmax.f32 %v2515_v49, %v2528_v30 }
 0x13b   : > { %v1020_v6 = vsel %vm988_vm2, %v1004_v0, %v972_v29  ;;  %vm1036_vm3 = vcmp.lt.f32.partialorder %v2368_v27, 0.0  ;;  %vm1044_vm4 = vcmp.lt.f32.partialorder %v2387_v32, 0.0  ;;  %vm1084_vm5 = vcmp.lt.f32.partialorder %v2377_v62, 0.0  ;;  %v2548_v27 = vpop.f32.mrf.mxu0 }
 0x13c   : > { %v1612_v52 = vpop.eup %1611  ;;  %v1052_v7 = vsub.f32 3.1415927, %v1020_v6  ;;  %772 = vst [vmem:[%s2121_s20 + $0x68] sm:$0xff] %v756_v22  ;;  %v980_v13 = vmul.f32 %v964_v11, %v884_v28  ;;  %v2540_v40 = vadd.f32 1e-30, %v2533_v9  ;;  %v829_v37 = vmin.f32 %v2468_v15, %v2487_v56 }
 0x13d   : > { %v644_v12 = vmul.f32 %v1612_v52, %v2504_v46  ;;  %v853_v4 = vadd.f32 1e-30, %v821_v47  ;;  %vm996_vm6 = vcmp.gt.f32.partialorder %v2431_v44, %v2423_v42  ;;  %vm1092_vm7 = vcmp.lt.f32.partialorder %v2391_v61, 0.0 }
 0x13e   : > { %v1068_v1 = vsel %vm1036_vm3, %v1052_v7, %v1020_v6  ;;  %v1012_v31 = vsub.f32 1.5707964, %v980_v13  ;;  %1615 = vrsqrt.f32 %v2540_v40  ;;  %v837_v43 = vmin.f32 %v2515_v49, %v2528_v30 }
 0x13f   : > { %v1614_v48 = vpop.eup %1613  ;;  %v1100_v55 = vsub.f32 0.0, %v1068_v1  ;;  %v645_v20 = vmul.f32 %v1612_v52, %v644_v12  ;;  %1617 = vrcp.f32 %v853_v4  ;;  %v2560_v34 = vand.u32 2147483647, %v2548_v27 }
 0x140   : > { %v1028_v23 = vsel %vm996_vm6, %v1012_v31, %v980_v13  ;;  %v877_v57 = vmul.f32 %v1614_v48, %v829_v37  ;;  %v526_v44 = vmul.f32 %v2548_v27, %v2548_v27  ;;  %v542_v39 = vmul.f32 %v2552_v21, %v2552_v21 }
 0x141   : > { %v1116_v50 = vsel %vm1084_vm5, %v1100_v55, %v1068_v1  ;;  %v1060_v16 = vsub.f32 3.1415927, %v1028_v23  ;;  %v646_v53 = vmul.f32 0.5, %v645_v20  ;;  %v2568_v28 = vand.u32 2147483647, %v2552_v21 }
 0x142   : > { %1132 = vst [vmem:[%s2171_s22 + $0x28] sm:$0xff] %v1116_v50  ;;  %v909_v42 = vmul.f32 0.0663, %v877_v57  ;;  %vm650_vm8 = vweird.f32 %v1612_v52  ;;  %v893_v60 = vsub.f32 1.0, %v877_v57  ;;  %v2576_v17 = vadd.f32 %v542_v39, %v526_v44 }
 0x143   : > { %v1076_v62 = vsel %vm1044_vm4, %v1060_v16, %v1028_v23  ;;  %v647_v18 = vsub.f32 1.5, %v646_v53  ;;  %v814_v58 = vmax.f32 %v2560_v34, %v2568_v28  ;;  %vm649_vm9 = vweird.f32 %v2504_v46 }
 0x144   : > { %v1616_v45 = vpop.eup %1615  ;;  %v1108_v38 = vsub.f32 0.0, %v1076_v62  ;;  %v925_v14 = vadd.f32 0.2447, %v909_v42  ;;  %v550_v24 = vmul.f32 %v2570_v8, %v2570_v8  ;;  %vm651_vm10 = vmor %vm649_vm9, %vm650_vm8  ;;  %v2587_v26 = vadd.f32 1e-30, %v2576_v17 }
 0x145   : > { %v1618_v5 = vpop.eup %1617  ;;  %v648_v59 = vmul.f32 %v1612_v52, %v647_v18  ;;  %v724_v32 = vmul.f32 %v1616_v45, %v2540_v40  ;;  %v534_v46 = vmul.f32 %v2574_v51, %v2574_v51  ;;  %v846_v33 = vadd.f32 1e-30, %v814_v58 }
 0x146   : > { %v1124_v25 = vsel %vm1092_vm7, %v1108_v38, %v1076_v62  ;;  %v941_v29 = vmul.f32 %v925_v14, %v893_v60  ;;  %v885_v2 = vmul.f32 %v1618_v5, %v837_v43  ;;  %v2594_v61 = vand.u32 2147483647, %v2574_v51 }
 0x147   : > { %1140 = vst [vmem:[%s2171_s22 + $0x68] sm:$0xff] %v1124_v25  ;;  %v652_v19 = vsel %vm651_vm10, %v1612_v52, %v648_v59  ;;  %v725_v63 = vmul.f32 %v1616_v45, %v724_v32  ;;  %1619 = vrsqrt.f32 %v2587_v26  ;;  %v2597_v47 = vadd.f32 %v550_v24, %v534_v46 }
 0x148   : > { %v749_v0 = vmul.f32 %v652_v19, %v2493_v41  ;;  %v957_v3 = vadd.f32 0.7853982, %v941_v29  ;;  %v917_v22 = vmul.f32 0.0663, %v885_v2  ;;  %v901_v6 = vsub.f32 1.0, %v885_v2 }
 0x149   : > { %v726_v11 = vmul.f32 0.5, %v725_v63  ;;  %1621 = vrcp.f32 %v846_v33  ;;  %v2601_v13 = vand.u32 2147483647, %v2570_v8  ;;  %vm730_vm11 = vweird.f32 %v1616_v45 }
 0x14a   : > { %765 = vst [vmem:[%s2121_s20 + $0x30] sm:$0xff] %v749_v0  ;;  %v973_v52 = vmul.f32 %v957_v3, %v877_v57  ;;  %v933_v7 = vadd.f32 0.2447, %v917_v22  ;;  %v2604_v41 = vadd.f32 1e-30, %v2597_v47  ;;  %vm989_vm12 = vcmp.gt.f32.partialorder %v2487_v56, %v2468_v15 }
 0x14b   : > { %v727_v12 = vsub.f32 1.5, %v726_v11  ;;  %v822_v31 = vmax.f32 %v2594_v61, %v2601_v13  ;;  %vm729_vm13 = vweird.f32 %v2540_v40  ;;  %v830_v50 = vmin.f32 %v2560_v34, %v2568_v28 }
 0x14c   : > { %v1005_v4 = vsub.f32 1.5707964, %v973_v52  ;;  %v949_v1 = vmul.f32 %v933_v7, %v901_v6  ;;  %1623 = vrsqrt.f32 %v2604_v41  ;;  %vm731_vm14 = vmor %vm729_vm13, %vm730_vm11  ;;  %vm1037_vm15 = vcmp.lt.f32.partialorder %v2454_v54, 0.0 }
 0x14d   : > { %v728_v37 = vmul.f32 %v1616_v45, %v727_v12  ;;  %v854_v20 = vadd.f32 1e-30, %v822_v31  ;;  %v1620_v23 = vpop.eup %1619  ;;  %vm1045_vm0 = vcmp.lt.f32.partialorder %v2470_v36, 0.0  ;;  %vm1085_vm1 = vcmp.lt.f32.partialorder %v2465_v10, 0.0 }
 0x14e   : > { %v1021_v48 = vsel %vm989_vm12, %v1005_v4, %v973_v52  ;;  %v965_v55 = vadd.f32 0.7853982, %v949_v1  ;;  %v654_v40 = vmul.f32 %v1620_v23, %v2587_v26  ;;  %vm997_vm2 = vcmp.gt.f32.partialorder %v2528_v30, %v2515_v49 }
 0x14f   : > { %v1053_v57 = vsub.f32 3.1415927, %v1021_v48  ;;  %v732_v43 = vsel %vm731_vm14, %v1616_v45, %v728_v37  ;;  %v1622_v16 = vpop.eup %1621  ;;  %1625 = vrcp.f32 %v854_v20  ;;  %vm660_vm3 = vweird.f32 %v1620_v23 }
 0x150   : > { %v757_v15 = vmul.f32 %v732_v43, %v2533_v9  ;;  %v981_v56 = vmul.f32 %v965_v55, %v885_v2  ;;  %v878_v42 = vmul.f32 %v1622_v16, %v830_v50  ;;  %v655_v62 = vmul.f32 %v1620_v23, %v654_v40 }
 0x151   : > { %v1069_v53 = vsel %vm1037_vm15, %v1053_v57, %v1021_v48  ;;  %v838_v10 = vmin.f32 %v2594_v61, %v2601_v13  ;;  %vm659_vm4 = vweird.f32 %v2587_v26  ;;  %vm1093_vm5 = vcmp.lt.f32.partialorder %v2509_v35, 0.0 }
 0x152   : > { %v1101_v44 = vsub.f32 0.0, %v1069_v53  ;;  %773 = vst [vmem:[%s2121_s20 + $0x70] sm:$0xff] %v757_v15  ;;  %v1013_v39 = vsub.f32 1.5707964, %v981_v56  ;;  %v1624_v18 = vpop.eup %1623  ;;  %v910_v54 = vmul.f32 0.0663, %v878_v42  ;;  %vm661_vm6 = vmor %vm659_vm4, %vm660_vm3  ;;  %vm739_vm8 = vweird.f32 %v2604_v41 }
 0x153   : > { %v656_v45 = vmul.f32 0.5, %v655_v62  ;;  %v734_v38 = vmul.f32 %v1624_v18, %v2604_v41  ;;  %v894_v58 = vsub.f32 1.0, %v878_v42  ;;  %vm740_vm7 = vweird.f32 %v1624_v18 }
 0x154   : > { %v1117_v9 = vsel %vm1085_vm1, %v1101_v44, %v1069_v53  ;;  %v1029_v60 = vsel %vm997_vm2, %v1013_v39, %v981_v56  ;;  %v926_v5 = vadd.f32 0.2447, %v910_v54  ;;  %vm741_vm9 = vmor %vm739_vm8, %vm740_vm7  ;;  %vm990_vm10 = vcmp.gt.f32.partialorder %v2568_v28, %v2560_v34 }
 0x155   : > { %1133 = vst [vmem:[%s2171_s22 + $0x30] sm:$0xff] %v1117_v9  ;;  %v1061_v14 = vsub.f32 3.1415927, %v1029_v60  ;;  %v657_v59 = vsub.f32 1.5, %v656_v45  ;;  %v735_v32 = vmul.f32 %v1624_v18, %v734_v38  ;;  %v1626_v24 = vpop.eup %1625  ;;  %vm1038_vm11 = vcmp.lt.f32.partialorder %v2548_v27, 0.0 }
 0x156   : > { %v942_v30 = vmul.f32 %v926_v5, %v894_v58  ;;  %v886_v19 = vmul.f32 %v1626_v24, %v838_v10 }
 0x157   : > { %v1077_v49 = vsel %vm1045_vm0, %v1061_v14, %v1029_v60  ;;  %v658_v29 = vmul.f32 %v1620_v23, %v657_v59  ;;  %v736_v2 = vmul.f32 0.5, %v735_v32 }
 0x158   : > { %v1109_v25 = vsub.f32 0.0, %v1077_v49  ;;  %v958_v36 = vadd.f32 0.7853982, %v942_v30  ;;  %v918_v3 = vmul.f32 0.0663, %v886_v19  ;;  %v902_v35 = vsub.f32 1.0, %v886_v19 }
 0x159   : > { %v662_v46 = vsel %vm661_vm6, %v1620_v23, %v658_v29  ;;  %v737_v33 = vsub.f32 1.5, %v736_v2 }
 0x15a   : > { %v1125_v63 = vsel %vm1093_vm5, %v1109_v25, %v1077_v49  ;;  %v750_v26 = vmul.f32 %v662_v46, %v2576_v17  ;;  %v974_v0 = vmul.f32 %v958_v36, %v878_v42  ;;  %v934_v6 = vadd.f32 0.2447, %v918_v3 }
 0x15b   : > { %1141 = vst [vmem:[%s2171_s22 + $0x70] sm:$0xff] %v1125_v63  ;;  %v738_v22 = vmul.f32 %v1624_v18, %v737_v33 }
 0x15c   : > { %766 = vst [vmem:[%s2121_s20 + $0x38] sm:$0xff] %v750_v26  ;;  %v1006_v11 = vsub.f32 1.5707964, %v974_v0  ;;  %v950_v12 = vmul.f32 %v934_v6, %v902_v35 }
 0x15d   : > { %v742_v52 = vsel %vm741_vm9, %v1624_v18, %v738_v22 }
 0x15e   : > { %v1022_v17 = vsel %vm990_vm10, %v1006_v11, %v974_v0  ;;  %v758_v7 = vmul.f32 %v742_v52, %v2597_v47  ;;  %v966_v41 = vadd.f32 0.7853982, %v950_v12 }
 0x15f   : > { %v1054_v4 = vsub.f32 3.1415927, %v1022_v17 }
 0x160   : > { %774 = vst [vmem:[%s2121_s20 + $0x78] sm:$0xff] %v758_v7 }
 0x161   : > { %v1070_v1 = vsel %vm1038_vm11, %v1054_v4, %v1022_v17 }
 0x162   : > { %1714 = shalt.err (!%p1711_p0)
}
 0x163   : > { %s1810_s1 = smov 128   ;;  %s1811_s20 = smov 8   ;;  %v1102_v27 = vsub.f32 0.0, %v1070_v1  ;;  %v982_v34 = vmul.f32 %v966_v41, %v886_v19  ;;  %vm1086_vm12 = vcmp.lt.f32.partialorder %v2552_v21, 0.0  ;;  %vm998_vm13 = vcmp.gt.f32.partialorder %v2601_v13, %v2594_v61 }
 0x164   : > { %1487 = dma.vmem_to_hbm [thread:$0]  (%p1914_p5), %s2643_s10, 2048, %s1165_s24, %s1144_s25, %s1810_s1, %s1810_s1, %s1811_s20   ;;  %vm1046_vm14 = vcmp.lt.f32.partialorder %v2574_v51, 0.0  ;;  %vm1094_vm15 = vcmp.lt.f32.partialorder %v2570_v8, 0.0 }
 0x165   : > { %v1118_v28 = vsel %vm1086_vm12, %v1102_v27, %v1070_v1  ;;  %v1014_v47 = vsub.f32 1.5707964, %v982_v34  ;;  %s1179_s7 = scalar_lea.hbm %s2716_s3, %s1455_s27  ;;  %s1180_s10 = sshll.u32 %s2171_s22, 4  ;;  %s1181_s10 = int_to_ptr.vmem [resolvable:$true] %s1180_s10 }
 0x166   : > { %1134 = vst [vmem:[%s2171_s22 + $0x38] sm:$0xff] %v1118_v28  ;;  %s1182_s24 = sshll.u32 %s1179_s7, 4  ;;  %s1149_s15 = scalar_lea.sflag [#allocation9], %s1937_s6  ;;  %s1183_s24 = int_to_ptr.hbm [resolvable:$true] %s1182_s24 }
 0x167   : > { %v1030_v31 = vsel %vm998_vm13, %v1014_v47, %v982_v34  ;;  %s1729_s25 = sshra.s32 %s1183_s24, 4  ;;  %s1735_s29 = scalar_lea.hbm %s2716_s3, 256  ;;  %s1730_s25 = int_to_ptr.hbm [resolvable:$true] %s1729_s25 }
 0x168   : > { %v1062_v37 = vsub.f32 3.1415927, %v1030_v31  ;;  %s1731_s26 = scalar_lea.hbm %s1730_s25, 128  ;;  %p1736_p2 = scmp.lt.s32.totalorder %s1730_s25, %s2716_s3 }
 0x169   : > { %p1732_p3 = scmp.ne.s32.totalorder %s1730_s25, %s1731_s26  ;;  %p1737_p1 = scmp.lt.s32.totalorder %s1735_s29, %s1731_s26 }
 0x16a   : > { %v1078_v21 = vsel %vm1046_vm14, %v1062_v37, %v1030_v31 }
 0x16b   : > { %v1110_v48 = vsub.f32 0.0, %v1078_v21  ;;  %p1733_p7 = pnand %p1732_p3, %p1914_p5  ;;  %p1738_p4 = por %p1737_p1, %p1736_p2 }
 0x16d   : > { %v1126_v55 = vsel %vm1094_vm15, %v1110_v48, %v1078_v21  ;;  %p1734_p9 = pneg %p1733_p7 }
 0x16e   : > { %1142 = vst [vmem:[%s2171_s22 + $0x78] sm:$0xff] %v1126_v55 }
 0x16f   : > { %p1739_p8 = pnand %p1738_p4, %p1734_p9 }
 0x171   : > { %1742 = shalt.err (!%p1739_p8)
}
 0x172   : > { %1488 = dma.vmem_to_hbm [thread:$0]  (%p1914_p5), %s1181_s10, 2048, %s1183_s24, %s1149_s15, %s1810_s1, %s1810_s1, %s1811_s20  }
 0x173 PF: > { %s1197_s6 = sand.u32 1, %s1785_s12   ;;  %p1500_p10 = pnand %p1317_p11, %p1881_p6 }
 0x174   : > { %s1198_s22 = scalar_lea.sflag [#allocation4], %s1197_s6 }
 0x175   : > { %p1501_p12 = pneg %p1500_p10 }
 0x177   : > { %1776 = dma.done.wait (%p1501_p12), %s1198_s22, 2048  }
 0x178   : > { %1778 = vsyncadd (%p1501_p12), %s1198_s22, 4294965248  ;;  %s1208_s11 = scalar_lea.sflag [#allocation9], %s1197_s6 }
 0x179   : > { %1780 = dma.done.wait (%p1501_p12), %s1208_s11, 2048  }
 0x17a   : > { %1782 = vsyncadd (%p1501_p12), %s1208_s11, 4294965248  ;;  %s24_s17 = sadd.s32 1, %s1805_s17   ;;  %s2728_s12 = smov %s1789_s13 }
 0x17b   : > { %p21_p13 = scmp.ge.s32.totalorder %s24_s17, 4   ;;  %s2729_s13 = smov %s1793_s14 }
 0x17c   : > { %s2730_s14 = smov %s1923_s18  ;;  %s2731_s15 = smov %s1801_s16 }
 0x17d   : > { %s2732_s16 = smov %s2734_s5  ;;  %23 = sbr.rel (!%p21_p13) target bundleno = 11 (0xb), region = 94 }
 0x182   :  { %1214 = vsyncpa [#allocation3], 1 }
 0x183   :  { %1216 = vsyncpa [#allocation3 + $0x1], 1 }
 0x184   :  { %1217 = vsyncpa [#allocation6], 1 }
 0x185   :  { %1218 = vsyncpa [#allocation4], 1 }
 0x186   :  { %1220 = vsyncpa [#allocation4 + $0x1], 1 }
 0x187   :  { %1221 = vsyncpa [#allocation9], 1 }
 0x188   :  { %1223 = vsyncpa [#allocation9 + $0x1], 1 }

</bundles_post_ra>
